<compile_context>
chip_gen: v7x
topology: tpu7x:2x2x1
jax: 0.10.0
libtpu: 0.0.40
codegen_flags: <defaults>
</compile_context>

<pallas_src>
import functools

import jax
import jax.numpy as jnp
from jax.experimental import pallas as pl
from jax.experimental.pallas import tpu as pltpu


# ----------------------------------------------------------------------------
# helpers
# ----------------------------------------------------------------------------
def _choose_tile(extent, target, align):
    """Largest tile <= target that is a multiple of `align` and divides `extent`,
    else the full extent (full extent is always a legal block shape)."""
    extent = int(extent)
    if extent <= target:
        return extent
    t = (target // align) * align
    while t >= align:
        if extent % t == 0:
            return t
        t -= align
    return extent


# ----------------------------------------------------------------------------
# Kernel 1: per-relation feature transform  T[j] = x @ W_aug[j]
#   W_aug[0] = root, W_aug[1:] = W_r   (one batched transform covers root + relations)
# ----------------------------------------------------------------------------
def _transform_kernel(x_ref, w_ref, t_ref):
    t_ref[...] = jnp.dot(
        x_ref[...], w_ref[...], preferred_element_type=jnp.float32
    ).astype(t_ref.dtype)


def relation_transform(x, w_aug, *, tm_target=512):
    """x: [N, f_in], w_aug: [R+1, f_in, f_out] -> T: [R+1, N, f_out] (bf16)."""
    rp1, f_in, f_out = w_aug.shape
    n = x.shape[0]
    tm = _choose_tile(n, tm_target, 16)
    return pl.pallas_call(
        _transform_kernel,
        out_shape=jax.ShapeDtypeStruct((rp1, n, f_out), jnp.bfloat16),
        grid_spec=pltpu.PrefetchScalarGridSpec(
            num_scalar_prefetch=0,
            grid=(rp1, n // tm),
            in_specs=[
                pl.BlockSpec((tm, f_in), lambda j, i: (i, 0)),                 # x tile
                pl.BlockSpec((pl.Squeezed(), f_in, f_out), lambda j, i: (j, 0, 0)),  # W_j
            ],
            out_specs=pl.BlockSpec((pl.Squeezed(), tm, f_out), lambda j, i: (j, i, 0)),
        ),
        compiler_params=pltpu.CompilerParams(
            dimension_semantics=("parallel", "parallel")),
    )(x.astype(jnp.bfloat16), w_aug.astype(jnp.bfloat16))


# ----------------------------------------------------------------------------
# Kernel 2: folded-relation aggregation (+ optional fused ReLU / classifier)
#   out[i_tile] = act( init[i_tile] + bias + sum_k A2[i_tile, k_tile] @ H[k_tile] )
#   (classifier:  out = act(...) @ Wc + bc, done in the last-K epilogue)
# ----------------------------------------------------------------------------
def _rgcn_agg_kernel(a_ref, h_ref, init_ref, bias_ref, *rest,
                     apply_relu, fuse_classifier):
    if fuse_classifier:
        wc_ref, bc_ref, o_ref, acc_ref = rest
    else:
        o_ref, acc_ref = rest

    k = pl.program_id(1)

    @pl.when(k == 0)
    def _():
        acc_ref[...] = init_ref[...].astype(jnp.float32) + bias_ref[...]

    acc_ref[...] += jnp.dot(a_ref[...], h_ref[...],
                            preferred_element_type=jnp.float32)

    @pl.when(k == pl.num_programs(1) - 1)
    def _():
        res = acc_ref[...]
        if apply_relu:
            res = jnp.maximum(res, 0.0)
        if fuse_classifier:
            res = jnp.dot(res, wc_ref[...],
                          preferred_element_type=jnp.float32) + bc_ref[...]
        o_ref[...] = res.astype(o_ref.dtype)


def rgcn_aggregate(a2, h, init, bias, *, apply_relu, out_dtype, classifier=None,
                   tm_target=512, tk_target=2048):
    n, k_dim = a2.shape
    f_out = h.shape[1]
    tm = _choose_tile(n, tm_target, 16)
    tk = _choose_tile(k_dim, tk_target, 128)

    in_specs = [
        pl.BlockSpec((tm, tk), lambda i, k: (i, k)),       # A2 tile (dominant stream)
        pl.BlockSpec((tk, f_out), lambda i, k: (k, 0)),    # H tile
        pl.BlockSpec((tm, f_out), lambda i, k: (i, 0)),    # init (resident over k)
        pl.BlockSpec((1, f_out), lambda i, k: (0, 0)),     # bias
    ]
    inputs = [a2.astype(jnp.bfloat16), h.astype(jnp.bfloat16),
              init.astype(jnp.bfloat16),
              bias.reshape(1, f_out).astype(jnp.float32)]

    if classifier is not None:
        wc, bc = classifier
        n_cls = wc.shape[1]
        in_specs += [pl.BlockSpec((f_out, n_cls), lambda i, k: (0, 0)),
                     pl.BlockSpec((1, n_cls), lambda i, k: (0, 0))]
        inputs += [wc.astype(jnp.float32), bc.reshape(1, n_cls).astype(jnp.float32)]
        out_cols = n_cls
    else:
        out_cols = f_out

    kern = functools.partial(_rgcn_agg_kernel, apply_relu=apply_relu,
                             fuse_classifier=classifier is not None)
    return pl.pallas_call(
        kern,
        out_shape=jax.ShapeDtypeStruct((n, out_cols), out_dtype),
        grid_spec=pltpu.PrefetchScalarGridSpec(
            num_scalar_prefetch=0,
            grid=(n // tm, k_dim // tk),
            in_specs=in_specs,
            out_specs=pl.BlockSpec((tm, out_cols), lambda i, k: (i, 0)),
            scratch_shapes=[pltpu.VMEM((tm, f_out), jnp.float32)],
        ),
        compiler_params=pltpu.CompilerParams(
            dimension_semantics=("parallel", "arbitrary"),   # node tiles // megacore
            vmem_limit_bytes=48 * 1024 * 1024),
    )(*inputs)


# ----------------------------------------------------------------------------
# Layer / model wrappers
# ----------------------------------------------------------------------------
def rgcn_layer(a2, x, w, root, bias, *, apply_relu, out_dtype, classifier=None,
               x_is_identity=False, tm_target=512, tk_target=2048):
    """One RGCNConv (+ optional fused ReLU / classifier).

    a2: folded adjacency [N, R*N] (columns ordered relation-major, source-minor).
    w:  per-relation weights [R, f_in, f_out] (already composed from bases).
    """
    r, f_in, f_out = w.shape
    n = a2.shape[0]
    if x_is_identity:
        # x = I_N  =>  x @ W_r = W_r,  x @ root = root   (requires f_in == N)
        h_stacked = w.reshape(r * f_in, f_out).astype(jnp.bfloat16)
        init = root.astype(jnp.bfloat16)
    else:
        w_aug = jnp.concatenate([root[None], w], axis=0)          # [R+1, f_in, f_out]
        t = relation_transform(x, w_aug, tm_target=tm_target)     # [R+1, N, f_out]
        init = t[0]                                               # x @ root
        h_stacked = t[1:].reshape(r * n, f_out)                   # stack_r(x @ W_r)
    return rgcn_aggregate(a2, h_stacked, init, bias,
                          apply_relu=apply_relu, out_dtype=out_dtype,
                          classifier=classifier,
                          tm_target=tm_target, tk_target=tk_target)


def rgcn_forward(x, a2, params, *, x_is_identity=False, tm_target=512, tk_target=2048):
    a2_bf16 = a2.astype(jnp.bfloat16)
    h1 = rgcn_layer(a2_bf16, None if x_is_identity else x,
                    params["w1"], params["root1"], params["bias1"],
                    apply_relu=True, out_dtype=jnp.bfloat16,
                    x_is_identity=x_is_identity,
                    tm_target=tm_target, tk_target=tk_target)
    logits = rgcn_layer(a2_bf16, h1,
                        params["w2"], params["root2"], params["bias2"],
                        apply_relu=False, out_dtype=jnp.float32,
                        classifier=(params["wc"], params["bc"]),
                        tm_target=tm_target, tk_target=tk_target)
    return logits


# ----------------------------------------------------------------------------
# Glue: edge list -> folded dense mean-normalized adjacency [N_dst, R * N_src]
# ----------------------------------------------------------------------------
def build_relation_adjacency(edge_index, edge_type, num_nodes, num_relations):
    src, dst = edge_index[0], edge_index[1]
    adj = jnp.zeros((num_nodes, num_relations, num_nodes), jnp.float32)
    adj = adj.at[dst, edge_type, src].add(1.0)            # count multi-edges
    deg = adj.sum(axis=-1, keepdims=True)                 # in-degree per (dst, rel)
    adj = jnp.where(deg > 0, adj / jnp.maximum(deg, 1.0), 0.0)   # mean aggregation
    return adj.reshape(num_nodes, num_relations * num_nodes)


# ----------------------------------------------------------------------------
# Pure-JAX reference (f32) for a loose numerical sanity check
# ----------------------------------------------------------------------------
def reference_forward(x, a2, params):
    n = x.shape[0]
    r = params["w1"].shape[0]
    adj3 = a2.reshape(n, r, n)

    def layer(h, w, root, bias):
        out = h @ root + bias
        for rr in range(r):
            out = out + adj3[:, rr, :] @ (h @ w[rr])
        return out

    h1 = jax.nn.relu(layer(x, params["w1"], params["root1"], params["bias1"]))
    h2 = layer(h1, params["w2"], params["root2"], params["bias2"])
    return h2 @ params["wc"] + params["bc"]


if __name__ == "__main__":
    key = jax.random.PRNGKey(0)

    # Small synthetic graph standing in for the torch.load'ed gnn_data tensors.
    num_nodes = 128            # len(entity_map); x = eye(num_nodes) -> in_channels = 128
    num_relations = 4          # len(relation_map)
    num_bases = 30             # fixed in the module
    hidden_channels = 32
    out_channels = 16
    num_adr = 8                # len(adr_ids)
    num_edges = 512
    in_channels = num_nodes

    keys = jax.random.split(key, 12)
    src = jax.random.randint(keys[0], (num_edges,), 0, num_nodes)
    dst = jax.random.randint(keys[1], (num_edges,), 0, num_nodes)
    edge_index = jnp.stack([src, dst]).astype(jnp.int32)
    edge_type = jax.random.randint(keys[2], (num_edges,), 0, num_relations)

    x = jnp.eye(num_nodes, dtype=jnp.float32)

    def glorot(k, shape):
        fan_in, fan_out = shape[-2], shape[-1]
        lim = (6.0 / (fan_in + fan_out)) ** 0.5
        return jax.random.uniform(k, shape, jnp.float32, -lim, lim)

    # conv1 (basis decomposition): W_r = sum_b comp[r,b] * basis[b]   (JAX glue)
    basis1 = glorot(keys[3], (num_bases, in_channels, hidden_channels))
    comp1 = glorot(keys[4], (num_relations, num_bases))
    params = {
        "w1": jnp.einsum("rb,bio->rio", comp1, basis1),
        "root1": glorot(keys[5], (in_channels, hidden_channels)),
        "bias1": jnp.zeros((hidden_channels,), jnp.float32),
    }
    # conv2
    basis2 = glorot(keys[6], (num_bases, hidden_channels, out_channels))
    comp2 = glorot(keys[7], (num_relations, num_bases))
    params["w2"] = jnp.einsum("rb,bio->rio", comp2, basis2)
    params["root2"] = glorot(keys[8], (hidden_channels, out_channels))
    params["bias2"] = jnp.zeros((out_channels,), jnp.float32)
    # classifier
    params["wc"] = glorot(keys[9], (out_channels, num_adr))
    params["bc"] = glorot(keys[10], (1, num_adr)).reshape(num_adr)

    a2 = build_relation_adjacency(edge_index, edge_type, num_nodes, num_relations)

    # Small tile targets so the demo exercises the multi-tile (parallel x arbitrary)
    # accumulation path; production sizes use the larger defaults.
    fwd = jax.jit(functools.partial(rgcn_forward, x_is_identity=True,
                                    tm_target=64, tk_target=128))
    logits = fwd(x, a2, params)
    jax.block_until_ready(logits)

    assert logits.shape == (num_nodes, num_adr)
    assert logits.dtype == jnp.float32

    # Loose check vs. a pure-f32 JAX reference (kernel uses bf16 MXU operands).
    ref = reference_forward(x, a2, params)
    err = float(jnp.max(jnp.abs(logits - ref)))
    tol = 1e-1 + 5e-2 * float(jnp.max(jnp.abs(ref)))
    assert err < tol, f"max abs error {err} exceeds tolerance {tol}"

    print("KERNEL_OK")
</pallas_src>

<mosaic_0001>
module attributes {stable_mosaic.version = 11 : i64} {
  func.func @_rgcn_agg_kernel(%arg0: i32, %arg1: i32, %arg2: memref<64x128xbf16, #tpu.memory_space<vmem>>, %arg3: memref<128x32xbf16, #tpu.memory_space<vmem>>, %arg4: memref<64x32xbf16, #tpu.memory_space<vmem>>, %arg5: memref<1x32xf32, #tpu.memory_space<vmem>>, %arg6: memref<64x32xbf16, #tpu.memory_space<vmem>>, %arg7: memref<64x32xf32, #tpu.memory_space<vmem>>) attributes {dimension_semantics = [#tpu.dimension_semantics<parallel>, #tpu.dimension_semantics<arbitrary>], iteration_bounds = array<i64: 2, 4>, scalar_prefetch = 0 : i64, scratch_operands = 1 : i64, tpu.core_type = #tpu.core_type<tc>, window_params = [{transform_indices = @transform_0, window_bounds = array<i64: 64, 128>}, {transform_indices = @transform_1, window_bounds = array<i64: 128, 32>}, {transform_indices = @transform_2, window_bounds = array<i64: 64, 32>}, {pipeline_mode = #tpu.pipeline_mode<synchronous>, transform_indices = @transform_3, window_bounds = array<i64: 1, 32>}, {transform_indices = @transform_4, window_bounds = array<i64: 64, 32>}]} {
    %c0_i32 = arith.constant 0 : i32
    %0 = arith.cmpi eq, %arg1, %c0_i32 : i32
    %1 = arith.extui %0 : i1 to i32
    %c0_i32_0 = arith.constant 0 : i32
    %2 = arith.cmpi ne, %1, %c0_i32_0 : i32
    scf.if %2 {
      %c0_9 = arith.constant 0 : index
      %c0_10 = arith.constant 0 : index
      %12 = vector.load %arg4[%c0_9, %c0_10] : memref<64x32xbf16, #tpu.memory_space<vmem>>, vector<64x32xbf16>
      %13 = arith.extf %12 : vector<64x32xbf16> to vector<64x32xf32>
      %c0_11 = arith.constant 0 : index
      %c0_12 = arith.constant 0 : index
      %14 = vector.load %arg5[%c0_11, %c0_12] : memref<1x32xf32, #tpu.memory_space<vmem>>, vector<1x32xf32>
      %15 = vector.broadcast %14 : vector<1x32xf32> to vector<64x32xf32>
      %16 = arith.addf %13, %15 : vector<64x32xf32>
      %c0_13 = arith.constant 0 : index
      %c0_14 = arith.constant 0 : index
      %17 = vector.load %arg7[%c0_13, %c0_14] : memref<64x32xf32, #tpu.memory_space<vmem>>, vector<64x32xf32>
      tpu.vector_store %arg7[%c0_13, %c0_14], %16 {strides = array<i32>} : memref<64x32xf32, #tpu.memory_space<vmem>>, vector<64x32xf32>,
    } else {
    }
    %c0 = arith.constant 0 : index
    %c0_1 = arith.constant 0 : index
    %3 = vector.load %arg7[%c0, %c0_1] : memref<64x32xf32, #tpu.memory_space<vmem>>, vector<64x32xf32>
    %c0_2 = arith.constant 0 : index
    %c0_3 = arith.constant 0 : index
    %4 = vector.load %arg2[%c0_2, %c0_3] : memref<64x128xbf16, #tpu.memory_space<vmem>>, vector<64x128xbf16>
    %c0_4 = arith.constant 0 : index
    %c0_5 = arith.constant 0 : index
    %5 = vector.load %arg3[%c0_4, %c0_5] : memref<128x32xbf16, #tpu.memory_space<vmem>>, vector<128x32xbf16>
    %cst = arith.constant dense<0.000000e+00> : vector<64x32xf32>
    %6 = tpu.matmul %4, %5, %cst {dimension_numbers = #tpu.dot_dimension_numbers<[1], [0], [0], [1], [0, 0, 1, 1], [], []>} : vector<64x128xbf16>, vector<128x32xbf16>, vector<64x32xf32> -> vector<64x32xf32>
    %7 = arith.addf %3, %6 : vector<64x32xf32>
    %c0_6 = arith.constant 0 : index
    %c0_7 = arith.constant 0 : index
    %8 = vector.load %arg7[%c0_6, %c0_7] : memref<64x32xf32, #tpu.memory_space<vmem>>, vector<64x32xf32>
    tpu.vector_store %arg7[%c0_6, %c0_7], %7 {strides = array<i32>} : memref<64x32xf32, #tpu.memory_space<vmem>>, vector<64x32xf32>,
    %c3_i32 = arith.constant 3 : i32
    %9 = arith.cmpi eq, %arg1, %c3_i32 : i32
    %10 = arith.extui %9 : i1 to i32
    %c0_i32_8 = arith.constant 0 : i32
    %11 = arith.cmpi ne, %10, %c0_i32_8 : i32
    scf.if %11 {
      %c0_9 = arith.constant 0 : index
      %c0_10 = arith.constant 0 : index
      %12 = vector.load %arg7[%c0_9, %c0_10] : memref<64x32xf32, #tpu.memory_space<vmem>>, vector<64x32xf32>
      %cst_11 = arith.constant 0.000000e+00 : f32
      %13 = vector.broadcast %cst_11 : f32 to vector<64x32xf32>
      %14 = arith.maximumf %12, %13 : vector<64x32xf32>
      %15 = arith.truncf %14 : vector<64x32xf32> to vector<64x32xbf16>
      %c0_12 = arith.constant 0 : index
      %c0_13 = arith.constant 0 : index
      %16 = vector.load %arg6[%c0_12, %c0_13] : memref<64x32xbf16, #tpu.memory_space<vmem>>, vector<64x32xbf16>
      tpu.vector_store %arg6[%c0_12, %c0_13], %15 {strides = array<i32>} : memref<64x32xbf16, #tpu.memory_space<vmem>>, vector<64x32xbf16>,
    } else {
    }
    return
  }
  func.func @transform_0(%arg0: i32, %arg1: i32) -> (i32, i32) {
    %c0_i32 = arith.constant 0 : i32
    return %arg0, %arg1 : i32, i32
  }
  func.func @transform_1(%arg0: i32, %arg1: i32) -> (i32, i32) {
    %c0_i32 = arith.constant 0 : i32
    %c0_i32_0 = arith.constant 0 : i32
    return %arg1, %c0_i32 : i32, i32
  }
  func.func @transform_2(%arg0: i32, %arg1: i32) -> (i32, i32) {
    %c0_i32 = arith.constant 0 : i32
    %c0_i32_0 = arith.constant 0 : i32
    return %arg0, %c0_i32 : i32, i32
  }
  func.func @transform_3(%arg0: i32, %arg1: i32) -> (i32, i32) {
    %c0_i32 = arith.constant 0 : i32
    %c0_i32_0 = arith.constant 0 : i32
    %c0_i32_1 = arith.constant 0 : i32
    return %c0_i32, %c0_i32_0 : i32, i32
  }
  func.func @transform_4(%arg0: i32, %arg1: i32) -> (i32, i32) {
    %c0_i32 = arith.constant 0 : i32
    %c0_i32_0 = arith.constant 0 : i32
    return %arg0, %c0_i32 : i32, i32
  }
}

module attributes {stable_mosaic.version = 11 : i64} {
  func.func @_transform_kernel(%arg0: i32, %arg1: i32, %arg2: memref<64x32xbf16, #tpu.memory_space<vmem>>, %arg3: memref<1x32x16xbf16, #tpu.memory_space<vmem>>, %arg4: memref<1x64x16xbf16, #tpu.memory_space<vmem>>) attributes {dimension_semantics = [#tpu.dimension_semantics<parallel>, #tpu.dimension_semantics<parallel>], iteration_bounds = array<i64: 5, 2>, scalar_prefetch = 0 : i64, scratch_operands = 0 : i64, tpu.core_type = #tpu.core_type<tc>, window_params = [{transform_indices = @transform_0, window_bounds = array<i64: 64, 32>}, {transform_indices = @transform_1, window_bounds = array<i64: 1, 32, 16>}, {transform_indices = @transform_2, window_bounds = array<i64: 1, 64, 16>}]} {
    %c0 = arith.constant 0 : index
    %c0_0 = arith.constant 0 : index
    %0 = vector.load %arg2[%c0, %c0_0] : memref<64x32xbf16, #tpu.memory_space<vmem>>, vector<64x32xbf16>
    %c0_1 = arith.constant 0 : index
    %c0_2 = arith.constant 0 : index
    %c0_3 = arith.constant 0 : index
    %1 = vector.load %arg3[%c0_1, %c0_2, %c0_3] : memref<1x32x16xbf16, #tpu.memory_space<vmem>>, vector<1x32x16xbf16>
    %2 = vector.shape_cast %1 : vector<1x32x16xbf16> to vector<32x16xbf16>
    %cst = arith.constant dense<0.000000e+00> : vector<64x16xf32>
    %3 = tpu.matmul %0, %2, %cst {dimension_numbers = #tpu.dot_dimension_numbers<[1], [0], [0], [1], [0, 0, 1, 1], [], []>} : vector<64x32xbf16>, vector<32x16xbf16>, vector<64x16xf32> -> vector<64x16xf32>
    %4 = arith.truncf %3 : vector<64x16xf32> to vector<64x16xbf16>
    %c0_4 = arith.constant 0 : index
    %c0_5 = arith.constant 0 : index
    %c0_6 = arith.constant 0 : index
    %5 = vector.load %arg4[%c0_4, %c0_5, %c0_6] : memref<1x64x16xbf16, #tpu.memory_space<vmem>>, vector<1x64x16xbf16>
    %6 = vector.shape_cast %5 : vector<1x64x16xbf16> to vector<64x16xbf16>
    %7 = vector.shape_cast %4 : vector<64x16xbf16> to vector<1x64x16xbf16>
    tpu.vector_store %arg4[%c0_4, %c0_5, %c0_6], %7 {strides = array<i32>} : memref<1x64x16xbf16, #tpu.memory_space<vmem>>, vector<1x64x16xbf16>,
    return
  }
  func.func @transform_0(%arg0: i32, %arg1: i32) -> (i32, i32) {
    %c0_i32 = arith.constant 0 : i32
    %c0_i32_0 = arith.constant 0 : i32
    return %arg1, %c0_i32 : i32, i32
  }
  func.func @transform_1(%arg0: i32, %arg1: i32) -> (i32, i32, i32) {
    %c0_i32 = arith.constant 0 : i32
    %c0_i32_0 = arith.constant 0 : i32
    %c0_i32_1 = arith.constant 0 : i32
    return %arg0, %c0_i32, %c0_i32_0 : i32, i32, i32
  }
  func.func @transform_2(%arg0: i32, %arg1: i32) -> (i32, i32, i32) {
    %c0_i32 = arith.constant 0 : i32
    %c0_i32_0 = arith.constant 0 : i32
    return %arg0, %arg1, %c0_i32 : i32, i32, i32
  }
}

module attributes {stable_mosaic.version = 11 : i64} {
  func.func @_rgcn_agg_kernel(%arg0: i32, %arg1: i32, %arg2: memref<64x128xbf16, #tpu.memory_space<vmem>>, %arg3: memref<128x16xbf16, #tpu.memory_space<vmem>>, %arg4: memref<64x16xbf16, #tpu.memory_space<vmem>>, %arg5: memref<1x16xf32, #tpu.memory_space<vmem>>, %arg6: memref<16x8xf32, #tpu.memory_space<vmem>>, %arg7: memref<1x8xf32, #tpu.memory_space<vmem>>, %arg8: memref<64x8xf32, #tpu.memory_space<vmem>>, %arg9: memref<64x16xf32, #tpu.memory_space<vmem>>) attributes {dimension_semantics = [#tpu.dimension_semantics<parallel>, #tpu.dimension_semantics<arbitrary>], iteration_bounds = array<i64: 2, 4>, scalar_prefetch = 0 : i64, scratch_operands = 1 : i64, tpu.core_type = #tpu.core_type<tc>, window_params = [{transform_indices = @transform_0, window_bounds = array<i64: 64, 128>}, {transform_indices = @transform_1, window_bounds = array<i64: 128, 16>}, {transform_indices = @transform_2, window_bounds = array<i64: 64, 16>}, {pipeline_mode = #tpu.pipeline_mode<synchronous>, transform_indices = @transform_3, window_bounds = array<i64: 1, 16>}, {pipeline_mode = #tpu.pipeline_mode<synchronous>, transform_indices = @transform_4, window_bounds = array<i64: 16, 8>}, {pipeline_mode = #tpu.pipeline_mode<synchronous>, transform_indices = @transform_5, window_bounds = array<i64: 1, 8>}, {transform_indices = @transform_6, window_bounds = array<i64: 64, 8>}]} {
    %c0_i32 = arith.constant 0 : i32
    %0 = arith.cmpi eq, %arg1, %c0_i32 : i32
    %1 = arith.extui %0 : i1 to i32
    %c0_i32_0 = arith.constant 0 : i32
    %2 = arith.cmpi ne, %1, %c0_i32_0 : i32
    scf.if %2 {
      %c0_9 = arith.constant 0 : index
      %c0_10 = arith.constant 0 : index
      %12 = vector.load %arg4[%c0_9, %c0_10] : memref<64x16xbf16, #tpu.memory_space<vmem>>, vector<64x16xbf16>
      %13 = arith.extf %12 : vector<64x16xbf16> to vector<64x16xf32>
      %c0_11 = arith.constant 0 : index
      %c0_12 = arith.constant 0 : index
      %14 = vector.load %arg5[%c0_11, %c0_12] : memref<1x16xf32, #tpu.memory_space<vmem>>, vector<1x16xf32>
      %15 = vector.broadcast %14 : vector<1x16xf32> to vector<64x16xf32>
      %16 = arith.addf %13, %15 : vector<64x16xf32>
      %c0_13 = arith.constant 0 : index
      %c0_14 = arith.constant 0 : index
      %17 = vector.load %arg9[%c0_13, %c0_14] : memref<64x16xf32, #tpu.memory_space<vmem>>, vector<64x16xf32>
      tpu.vector_store %arg9[%c0_13, %c0_14], %16 {strides = array<i32>} : memref<64x16xf32, #tpu.memory_space<vmem>>, vector<64x16xf32>,
    } else {
    }
    %c0 = arith.constant 0 : index
    %c0_1 = arith.constant 0 : index
    %3 = vector.load %arg9[%c0, %c0_1] : memref<64x16xf32, #tpu.memory_space<vmem>>, vector<64x16xf32>
    %c0_2 = arith.constant 0 : index
    %c0_3 = arith.constant 0 : index
    %4 = vector.load %arg2[%c0_2, %c0_3] : memref<64x128xbf16, #tpu.memory_space<vmem>>, vector<64x128xbf16>
    %c0_4 = arith.constant 0 : index
    %c0_5 = arith.constant 0 : index
    %5 = vector.load %arg3[%c0_4, %c0_5] : memref<128x16xbf16, #tpu.memory_space<vmem>>, vector<128x16xbf16>
    %cst = arith.constant dense<0.000000e+00> : vector<64x16xf32>
    %6 = tpu.matmul %4, %5, %cst {dimension_numbers = #tpu.dot_dimension_numbers<[1], [0], [0], [1], [0, 0, 1, 1], [], []>} : vector<64x128xbf16>, vector<128x16xbf16>, vector<64x16xf32> -> vector<64x16xf32>
    %7 = arith.addf %3, %6 : vector<64x16xf32>
    %c0_6 = arith.constant 0 : index
    %c0_7 = arith.constant 0 : index
    %8 = vector.load %arg9[%c0_6, %c0_7] : memref<64x16xf32, #tpu.memory_space<vmem>>, vector<64x16xf32>
    tpu.vector_store %arg9[%c0_6, %c0_7], %7 {strides = array<i32>} : memref<64x16xf32, #tpu.memory_space<vmem>>, vector<64x16xf32>,
    %c3_i32 = arith.constant 3 : i32
    %9 = arith.cmpi eq, %arg1, %c3_i32 : i32
    %10 = arith.extui %9 : i1 to i32
    %c0_i32_8 = arith.constant 0 : i32
    %11 = arith.cmpi ne, %10, %c0_i32_8 : i32
    scf.if %11 {
      %c0_9 = arith.constant 0 : index
      %c0_10 = arith.constant 0 : index
      %12 = vector.load %arg9[%c0_9, %c0_10] : memref<64x16xf32, #tpu.memory_space<vmem>>, vector<64x16xf32>
      %c0_11 = arith.constant 0 : index
      %c0_12 = arith.constant 0 : index
      %13 = vector.load %arg6[%c0_11, %c0_12] : memref<16x8xf32, #tpu.memory_space<vmem>>, vector<16x8xf32>
      %cst_13 = arith.constant dense<0.000000e+00> : vector<64x8xf32>
      %14 = tpu.matmul %12, %13, %cst_13 {dimension_numbers = #tpu.dot_dimension_numbers<[1], [0], [0], [1], [0, 0, 1, 1], [], []>} : vector<64x16xf32>, vector<16x8xf32>, vector<64x8xf32> -> vector<64x8xf32>
      %c0_14 = arith.constant 0 : index
      %c0_15 = arith.constant 0 : index
      %15 = vector.load %arg7[%c0_14, %c0_15] : memref<1x8xf32, #tpu.memory_space<vmem>>, vector<1x8xf32>
      %16 = vector.broadcast %15 : vector<1x8xf32> to vector<64x8xf32>
      %17 = arith.addf %14, %16 : vector<64x8xf32>
      %c0_16 = arith.constant 0 : index
      %c0_17 = arith.constant 0 : index
      %18 = vector.load %arg8[%c0_16, %c0_17] : memref<64x8xf32, #tpu.memory_space<vmem>>, vector<64x8xf32>
      tpu.vector_store %arg8[%c0_16, %c0_17], %17 {strides = array<i32>} : memref<64x8xf32, #tpu.memory_space<vmem>>, vector<64x8xf32>,
    } else {
    }
    return
  }
  func.func @transform_0(%arg0: i32, %arg1: i32) -> (i32, i32) {
    %c0_i32 = arith.constant 0 : i32
    return %arg0, %arg1 : i32, i32
  }
  func.func @transform_1(%arg0: i32, %arg1: i32) -> (i32, i32) {
    %c0_i32 = arith.constant 0 : i32
    %c0_i32_0 = arith.constant 0 : i32
    return %arg1, %c0_i32 : i32, i32
  }
  func.func @transform_2(%arg0: i32, %arg1: i32) -> (i32, i32) {
    %c0_i32 = arith.constant 0 : i32
    %c0_i32_0 = arith.constant 0 : i32
    return %arg0, %c0_i32 : i32, i32
  }
  func.func @transform_3(%arg0: i32, %arg1: i32) -> (i32, i32) {
    %c0_i32 = arith.constant 0 : i32
    %c0_i32_0 = arith.constant 0 : i32
    %c0_i32_1 = arith.constant 0 : i32
    return %c0_i32, %c0_i32_0 : i32, i32
  }
  func.func @transform_4(%arg0: i32, %arg1: i32) -> (i32, i32) {
    %c0_i32 = arith.constant 0 : i32
    %c0_i32_0 = arith.constant 0 : i32
    %c0_i32_1 = arith.constant 0 : i32
    return %c0_i32, %c0_i32_0 : i32, i32
  }
  func.func @transform_5(%arg0: i32, %arg1: i32) -> (i32, i32) {
    %c0_i32 = arith.constant 0 : i32
    %c0_i32_0 = arith.constant 0 : i32
    %c0_i32_1 = arith.constant 0 : i32
    return %c0_i32, %c0_i32_0 : i32, i32
  }
  func.func @transform_6(%arg0: i32, %arg1: i32) -> (i32, i32) {
    %c0_i32 = arith.constant 0 : i32
    %c0_i32_0 = arith.constant 0 : i32
    return %arg0, %c0_i32 : i32, i32
  }
}

</mosaic_0001>

<bundles_post_ra>
// kernel: rgcn_forward.4
= control target key start
LH: loop header
LB: loop body
LE: loop exit
PB: predicated region body
PF: predicated region fallthrough
CT: control target
= control target key end

     0   :  { %s613_s9 = smov 0   ;;  %s615_s10 = smov 0   ;;  %s675_s0 = inlined_call_operand.vmem [shape: bf16[128,32], index: 0, kind: input, shape index: {}]   ;;  %s676_s1 = inlined_call_operand.vmem [shape: bf16[5,32,16], index: 1, kind: input, shape index: {}]   ;;  %s677_s2 = inlined_call_operand.vmem [shape: bf16[5,128,16], index: 2, kind: output, shape index: {}]  }
   0x1   :  { %s617_s11 = smov 0   ;;  %s619_s12 = smov 0  }
   0x2   :  { %s621_s13 = smov 0  }
   0x3 LB: > { %s21_s14 = sadd.s32 1, %s588_s11  ;;  %s24_s15 = sadd.s32 1, %s592_s12  ;;  %s596_s13 = sphi %s621_s13, %s12_s13   ;;  %s592_s12 = sphi %s619_s12, %s681_s12   ;;  %s588_s11 = sphi %s617_s11, %s680_s11   ;;  %s584_s10 = sphi %s615_s10, %s679_s10   ;;  %s580_s9 = sphi %s613_s9, %s678_s9  }
   0x4   : > { %p22_p0 = scmp.ge.s32.totalorder %s21_s14, 2  ;;  %p453_p1 = scmp.ge.s32.totalorder %s596_s13, 1 }
   0x5   : > { %p137_p2 = scmp.lt.s32.totalorder %s596_s13, 11 }
   0x6   : > { %s683_s14 = smov (%p22_p0, %s21_s14), 0  ;;  %s685_s15 = smov (!%p22_p0, %s24_s15), %s592_s12 }
   0x7   : > { %p138_p3 = pnand %p453_p1, %p137_p2  ;;  %p26_p4 = scmp.ge.s32.totalorder %s685_s15, 5 }
   0x8   : > { %s454_s16 = sshll.u32 (!%p138_p3), %s580_s9, 3  ;;  %p174_p5 = scmp.lt.s32.totalorder (!%p138_p3), %s584_s10, 4  ;;  %vm234_vm0 = vcmask (!%p138_p3), 261120   ;;  %vm344_vm1 = vcmask (!%p138_p3), 125952  }
   0x9   : > { %s687_s15 = smov (%p26_p4, %s685_s15), 0  ;;  %141 = sbr.rel (%p138_p3) target bundleno = 246 (0xf6), region = 28 }
   0xa   : > { %p169_p6 = scmp.lt.s32.totalorder (!%p138_p3), %s454_s16, 15 }
  0x10   : > { %s689_s10 = smov (!%p174_p5, %s584_s10), 4  ;;  %s691_s16 = smov (!%p169_p6, %s454_s16), 15 }
  0x11   : > { %s481_s17 = sshll.u32 %s689_s10, 4  ;;  %s455_s18 = sshll.u32 %s691_s16, 2 }
  0x12   : > { %s178_s21 = scalar_lea.vmem %s676_s1, %s481_s17  ;;  %s185_s22 = sadd.s32 %s481_s17, %s691_s16 }
  0x13   : > { %v552_v0 = vld [vmem:[%s178_s21] sm:$0xff]   ;;  %s172_s25 = scalar_lea.vmem %s675_s0, %s455_s18  ;;  %v553_v1 = vld [vmem:[%s178_s21 + $0x8] sm:$0xff]   ;;  %s460_s26 = sshll.u32 %s185_s22, 2 }
  0x14   : > { %496 = vmatprep.subr.bf16.mxu0 %v552_v0  ;;  %508 = vmatprep.subr.bf16.mxu1 %v552_v0  ;;  %v554_v2 = vld [vmem:[%s172_s25] sm:$0xff]   ;;  %v555_v3 = vld [vmem:[%s172_s25 + $0x10] sm:$0xff]   ;;  %v556_v4 = vld [vmem:[%s172_s25 + $0x8] sm:$0xff]   ;;  %s187_s29 = scalar_lea.vmem %s677_s2, %s460_s26 }
  0x15   : > { %497 = vmatpush3.bf16.msra.mxu0 %v552_v0  ;;  %510 = vmatpush3.bf16.msra.mxu1 %v552_v0  ;;  %v557_v5 = vld [vmem:[%s172_s25 + $0x18] sm:$0xff]  }
  0x16   : > { %498 = vmatprep.subr.bf16.mxu0 %v553_v1  ;;  %509 = vmatprep.subr.bf16.mxu1 %v553_v1 }
  0x17   : > { %500 = vmatprep.mubr.msk.bf16.mxu0 %vm234_vm0, %v554_v2  ;;  %504 = vmatprep.mubr.msk.bf16.mxu1 %vm234_vm0, %v555_v3 }
  0x19   : > { %499 = vmatpush3.bf16.msra.mxu0 %v553_v1  ;;  %511 = vmatpush3.bf16.msra.mxu1 %v553_v1 }
  0x1c   : > { %501 = vmatmul.mubr.msk.bf16.vlgmr.msra.gmra.mrb[0].mxu0 %vm234_vm0, %v556_v4  ;;  %505 = vmatmul.mubr.msk.bf16.vlgmr.msra.gmra.mrb[0].mxu1 %vm234_vm0, %v557_v5 }
  0xef   : > { %v502_v6 = vpop.f32.mrb[0].mxu0  ;;  %v506_v7 = vpop.f32.mrb[0].mxu1 }
  0xf0   : > { %v484_v8 = vpack.c.bf16 %v502_v6, %v502_v6  ;;  %v488_v9 = vpack.c.bf16 %v506_v7, %v506_v7  ;;  %v281_v10 = vpop.f32.mrb[1].mxu0  ;;  %v297_v11 = vpop.f32.mrb[1].mxu1 }
  0xf1   : > { %v482_v12 = vpack.c.bf16 %v281_v10, %v281_v10  ;;  %v486_v13 = vpack.c.bf16 %v297_v11, %v297_v11  ;;  %v503_v14 = vpop.f32.mrb[2].mxu0  ;;  %v507_v15 = vpop.f32.mrb[2].mxu1 }
  0xf2   : > { %347 = vst.msk [vmem:[%s187_s29 + $0x8] sm:$0xf] %vm344_vm1, %v484_v8  ;;  %351 = vst.msk [vmem:[%s187_s29 + $0x18] sm:$0xf] %vm344_vm1, %v488_v9  ;;  %v485_v16 = vpack.c.bf16 %v503_v14, %v503_v14  ;;  %v489_v17 = vpack.c.bf16 %v507_v15, %v507_v15  ;;  %v284_v18 = vpop.f32.mrb[3].mxu0  ;;  %v300_v19 = vpop.f32.mrb[3].mxu1 }
  0xf3   : > { %345 = vst.msk [vmem:[%s187_s29] sm:$0xf] %vm344_vm1, %v482_v12  ;;  %349 = vst.msk [vmem:[%s187_s29 + $0x10] sm:$0xf] %vm344_vm1, %v486_v13  ;;  %v483_v20 = vpack.c.bf16 %v284_v18, %v284_v18  ;;  %v487_v21 = vpack.c.bf16 %v300_v19, %v300_v19 }
  0xf4   : > { %348 = vst.msk [vmem:[%s187_s29 + $0xc] sm:$0xf] %vm344_vm1, %v485_v16  ;;  %352 = vst.msk [vmem:[%s187_s29 + $0x1c] sm:$0xf] %vm344_vm1, %v489_v17 }
  0xf5   : > { %346 = vst.msk [vmem:[%s187_s29 + $0x4] sm:$0xf] %vm344_vm1, %v483_v20  ;;  %350 = vst.msk [vmem:[%s187_s29 + $0x14] sm:$0xf] %vm344_vm1, %v487_v21 }
  0xf6 PF: > { %s12_s13 = sadd.s32 1, %s596_s13   ;;  %s678_s9 = smov %s588_s11 }
  0xf7   : > { %p9_p7 = scmp.ge.s32.totalorder %s12_s13, 12   ;;  %s679_s10 = smov %s592_s12 }
  0xf8   : > { %s680_s11 = smov %s683_s14  ;;  %s681_s12 = smov %s687_s15 }
  0xf9   :  { %11 = sbr.rel (!%p9_p7) target bundleno = 3 (0x3), region = 61 }

// kernel: rgcn_forward.3
= control target key start
LH: loop header
LB: loop body
LE: loop exit
PB: predicated region body
PF: predicated region fallthrough
CT: control target
= control target key end

     0   :  { %s992_s15 = smov 0   ;;  %s994_s16 = smov 0   ;;  %s1142_s0 = inlined_call_operand.vmem [shape: bf16[128,512], index: 0, kind: input, shape index: {}]   ;;  %s1143_s1 = inlined_call_operand.vmem [shape: bf16[512,32], index: 1, kind: input, shape index: {}]   ;;  %s1144_s2 = inlined_call_operand.vmem [shape: bf16[128,32], index: 2, kind: input, shape index: {}]   ;;  %s1145_s3 = inlined_call_operand.vmem [shape: f32[1,32], index: 3, kind: input, shape index: {}]   ;;  %s1146_s4 = inlined_call_operand.vmem [shape: bf16[128,32], index: 4, kind: output, shape index: {}]  }
   0x1   :  { %s996_s17 = smov 0   ;;  %s998_s18 = smov 0  }
   0x2   :  { %s1000_s19 = smov 0   ;;  %s1002_s20 = smov 0  }
   0x3   :  { %s1004_s21 = smov 0  }
   0x4 LB: > { %s23_s22 = sadd.s32 1, %s957_s19  ;;  %s26_s23 = sadd.s32 1, %s961_s20  ;;  %s965_s21 = sphi %s1004_s21, %s14_s21   ;;  %s961_s20 = sphi %s1002_s20, %s1152_s20   ;;  %s957_s19 = sphi %s1000_s19, %s1151_s19   ;;  %s953_s18 = sphi %s998_s18, %s1150_s18   ;;  %s949_s17 = sphi %s996_s17, %s1149_s17   ;;  %s945_s16 = sphi %s994_s16, %s1148_s16   ;;  %s941_s15 = sphi %s992_s15, %s1147_s15  }
   0x5   : > { %p24_p0 = scmp.ge.s32.totalorder %s23_s22, 4  ;;  %p42_p1 = scmp.ne.s32.totalorder %s945_s16, %s941_s15 }
   0x6   : > { %p43_p2 = scmp.eq.s32.totalorder %s965_s21, 0  ;;  %s35_s27 = sadd.s32 1, %s945_s16 }
   0x7   : > { %s1154_s22 = smov (%p24_p0, %s23_s22), 0  ;;  %s1156_s23 = smov (!%p24_p0, %s26_s23), %s961_s20 }
   0x8   : > { %p44_p3 = por %p43_p2, %p42_p1  ;;  %p28_p4 = scmp.ge.s32.totalorder %s1156_s23, 2 }
   0x9   : > { %s31_s24 = ssub.s32 %s957_s19, %s1154_s22  ;;  %p725_p6 = scmp.ge.s32.totalorder %s965_s21, 8 }
   0xa   : > { %s1158_s23 = smov (%p28_p4, %s1156_s23), 0 }
   0xb   : > { %s30_s25 = ssub.s32 %s961_s20, %s1158_s23  ;;  %170 = sbr.rel (%p725_p6) target bundleno = 29 (0x1d), region = 20 }
   0xc   : > { %s32_s26 = sor.u32 %s31_s24, %s30_s25 }
   0xd   : > { %p33_p5 = scmp.eq.s32.totalorder %s32_s26, 0 }
   0xf   : > { %s1043_s28 = scalar_select %p33_p5, %s945_s16, %s35_s27  }
  0x12   : > { %173 = sbr.rel (!%p44_p3) target bundleno = 29 (0x1d), region = 24  ;;  %s175_s29 = sand.u32 (%p44_p3), 1, %s945_s16  }
  0x13   : > { %s763_s30 = sshll.u32 (%p44_p3), %s961_s20, 5  ;;  %s726_s5 = sshll.u32 (%p44_p3), %s175_s29, 5 }
  0x14   : > { %s180_s6 = sadd.s32 (%p44_p3), %s957_s19, %s763_s30  ;;  %s177_s11 = scalar_lea.vmem (%p44_p3), [#allocation3], %s726_s5 }
  0x15   : > { %s729_s7 = sshll.u32 (%p44_p3), %s180_s6, 2 }
  0x16   : > { %s182_s10 = scalar_lea.vmem (%p44_p3), %s1142_s0, %s729_s7 }
  0x17   : > { %v198_v0 = vld [vmem:[%s182_s10] sm:$0xf] (%p44_p3)  ;;  %v200_v1 = vld [vmem:[%s182_s10 + $0x10] sm:$0xf] (%p44_p3) }
  0x18   : > { %v202_v2 = vld [vmem:[%s182_s10 + $0x20] sm:$0xf] (%p44_p3)  ;;  %199 = vst [vmem:[%s177_s11] sm:$0xf] (%p44_p3), %v198_v0  ;;  %201 = vst [vmem:[%s177_s11 + $0x4] sm:$0xf] (%p44_p3), %v200_v1 }
  0x19   : > { %203 = vst [vmem:[%s177_s11 + $0x8] sm:$0xf] %v202_v2  ;;  %v204_v3 = vld [vmem:[%s182_s10 + $0x30] sm:$0xf]  ;;  %v206_v4 = vld [vmem:[%s182_s10 + $0x40] sm:$0xf] }
  0x1a   : > { %v208_v5 = vld [vmem:[%s182_s10 + $0x50] sm:$0xf]  ;;  %205 = vst [vmem:[%s177_s11 + $0xc] sm:$0xf] %v204_v3  ;;  %207 = vst [vmem:[%s177_s11 + $0x10] sm:$0xf] %v206_v4 }
  0x1b   : > { %209 = vst [vmem:[%s177_s11 + $0x14] sm:$0xf] %v208_v5  ;;  %v210_v6 = vld [vmem:[%s182_s10 + $0x60] sm:$0xf]  ;;  %v212_v7 = vld [vmem:[%s182_s10 + $0x70] sm:$0xf] }
  0x1c   : > { %211 = vst [vmem:[%s177_s11 + $0x18] sm:$0xf] %v210_v6  ;;  %213 = vst [vmem:[%s177_s11 + $0x1c] sm:$0xf] %v212_v7 }
  0x1d PF: > { %p730_p7 = scmp.ge.s32.totalorder %s965_s21, 1  ;;  %p269_p8 = scmp.lt.s32.totalorder %s965_s21, 9 }
  0x1f   : > { %p270_p9 = pnand %p730_p7, %p269_p8 }
  0x20   : > { %s276_s12 = sand.u32 (!%p270_p9), 1, %s941_s15   ;;  %s732_s13 = sshll.u32 (!%p270_p9), %s949_s17, 4 }
  0x21   : > { %273 = sbr.rel (%p270_p9) target bundleno = 316 (0x13c), region = 73  ;;  %s731_s14 = sshll.u32 (!%p270_p9), %s276_s12, 5 }
  0x22   : > { %p313_p10 = scmp.lt.s32.totalorder (!%p270_p9), %s732_s13, 63  ;;  %s734_s24 = sshll.u32 (!%p270_p9), %s953_s18, 3 }
  0x23   : > { %p319_p11 = scmp.lt.s32.totalorder (!%p270_p9), %s734_s24, 15  ;;  %s1070_s18 = scalar_lea.vmem (!%p270_p9), [#allocation3], %s731_s14 }
  0x24   : > { %p738_p12 = scmp.ne.s32.totalorder (!%p270_p9), %s949_s17, 0 }
  0x28   : > { %s1160_s13 = smov (!%p313_p10, %s732_s13), 63  ;;  %s1162_s24 = smov (!%p319_p11, %s734_s24), 15 }
  0x29   : > { %s733_s25 = sshll.u32 %s1160_s13, 2  ;;  %s735_s30 = sshll.u32 %s1162_s24, 2  ;;  %v739_v9 = vld [vmem:[%s1145_s3] ss:$0 sm:$0xff] (!%p738_p12)  ;;  %vm366_vm0 = vcmask (!%p738_p12), 261120  }
  0x2a   : > { %s1060_s29 = scalar_lea.vmem %s1143_s1, %s733_s25  ;;  %s322_s7 = scalar_lea.vmem %s1144_s2, %s735_s30 }
  0x2b   : > { %s1068_s9 = scalar_lea.vmem %s1146_s4, %s735_s30  ;;  %334 = sbr.rel (%p738_p12) target bundleno = 52 (0x34), region = 81  ;;  %v773_v8 = vld [vmem:[%s322_s7] sm:$0xff] (!%p738_p12)   ;;  %v788_v10 = vld [vmem:[%s322_s7 + $0x8] sm:$0xff] (!%p738_p12)   ;;  %v789_v15 = vld [vmem:[%s322_s7 + $0x10] sm:$0xff] (!%p738_p12)  }
  0x2c   : > { %v774_v11 = vunpack.c.l.bf16 (!%p738_p12), %v773_v8  ;;  %v775_v12 = vunpack.c.h.bf16 (!%p738_p12), %v773_v8  ;;  %v778_v13 = vunpack.c.l.bf16 (!%p738_p12), %v788_v10  ;;  %v779_v14 = vunpack.c.h.bf16 (!%p738_p12), %v788_v10  ;;  %v790_v16 = vld [vmem:[%s322_s7 + $0x18] sm:$0xff] (!%p738_p12)  }
  0x2d   : > { %v782_v17 = vunpack.c.l.bf16 (!%p738_p12), %v789_v15  ;;  %v783_v18 = vunpack.c.h.bf16 (!%p738_p12), %v789_v15  ;;  %v786_v19 = vunpack.c.l.bf16 (!%p738_p12), %v790_v16  ;;  %v787_v20 = vunpack.c.h.bf16 (!%p738_p12), %v790_v16 }
  0x2e   : > { %v358_v21 = vadd.f32 (!%p738_p12), %v774_v11, %v739_v9  ;;  %v359_v22 = vadd.f32 (!%p738_p12), %v775_v12, %v739_v9  ;;  %v360_v23 = vadd.f32 (!%p738_p12), %v778_v13, %v739_v9  ;;  %v361_v24 = vadd.f32 (!%p738_p12), %v779_v14, %v739_v9 }
  0x2f   : > { %v362_v25 = vadd.f32 (!%p738_p12), %v782_v17, %v739_v9  ;;  %v363_v26 = vadd.f32 (!%p738_p12), %v783_v18, %v739_v9  ;;  %v364_v27 = vadd.f32 (!%p738_p12), %v786_v19, %v739_v9  ;;  %v365_v28 = vadd.f32 (!%p738_p12), %v787_v20, %v739_v9 }
  0x30   : > { %367 = vst.msk [vmem:[#allocation2] sm:$0xff] (!%p738_p12), %vm366_vm0, %v358_v21  ;;  %368 = vst.msk [vmem:[#allocation2 + $0x8] sm:$0xff] (!%p738_p12), %vm366_vm0, %v359_v22 }
  0x31   : > { %369 = vst.msk [vmem:[#allocation2 + $0x10] sm:$0xff] (!%p738_p12), %vm366_vm0, %v360_v23  ;;  %370 = vst.msk [vmem:[#allocation2 + $0x18] sm:$0xff] (!%p738_p12), %vm366_vm0, %v361_v24 }
  0x32   : > { %371 = vst.msk [vmem:[#allocation2 + $0x20] sm:$0xff] %vm366_vm0, %v362_v25  ;;  %372 = vst.msk [vmem:[#allocation2 + $0x28] sm:$0xff] %vm366_vm0, %v363_v26 }
  0x33   : > { %373 = vst.msk [vmem:[#allocation2 + $0x30] sm:$0xff] %vm366_vm0, %v364_v27  ;;  %374 = vst.msk [vmem:[#allocation2 + $0x38] sm:$0xff] %vm366_vm0, %v365_v28 }
  0x34 PF: > { %v899_v29 = vld [vmem:[%s1060_s29] sm:$0xff]   ;;  %v900_v30 = vld [vmem:[%s1060_s29 + $0x8] sm:$0xff]   ;;  %v901_v31 = vld [vmem:[%s1060_s29 + $0x10] sm:$0xff]   ;;  %vm552_vm1 = vcmask 261120   ;;  %p752_p13 = scmp.ne.s32.totalorder %s949_s17, 3 }
  0x35   : > { %803 = vmatprep.subr.bf16.mxu0 %v899_v29  ;;  %827 = vmatprep.subr.bf16.mxu1 %v899_v29  ;;  %v902_v32 = vld [vmem:[%s1060_s29 + $0x18] sm:$0xff]   ;;  %v907_v33 = vld [vmem:[%s1070_s18] sm:$0xff]   ;;  %v908_v34 = vld [vmem:[%s1070_s18 + $0x10] sm:$0xff]   ;;  %vm613_vm2 = vcmask (!%p752_p13), 257024  }
  0x36   : > { %804 = vmatpush3.bf16.msra.mxu0 %v899_v29  ;;  %835 = vmatpush3.bf16.msra.mxu1 %v899_v29  ;;  %v903_v35 = vld [vmem:[%s1060_s29 + $0x20] sm:$0xff]   ;;  %v904_v36 = vld [vmem:[%s1060_s29 + $0x28] sm:$0xff]   ;;  %v905_v37 = vld [vmem:[%s1060_s29 + $0x30] sm:$0xff]  }
  0x37   : > { %805 = vmatprep.subr.bf16.mxu0 %v900_v30  ;;  %828 = vmatprep.subr.bf16.mxu1 %v900_v30  ;;  %v906_v38 = vld [vmem:[%s1060_s29 + $0x38] sm:$0xff]   ;;  %v909_v39 = vld [vmem:[%s1070_s18 + $0x8] sm:$0xff]  }
  0x38   : > { %819 = vmatprep.mubr.bf16.mxu0 %v907_v33  ;;  %823 = vmatprep.mubr.bf16.mxu1 %v908_v34  ;;  %v910_v40 = vld [vmem:[%s1070_s18 + $0x18] sm:$0xff]  }
  0x39   : > { %v375_v43 = vld [vmem:[#allocation2] sm:$0xff]  ;;  %v376_v53 = vld [vmem:[#allocation2 + $0x8] sm:$0xff] }
  0x3a   : > { %806 = vmatpush3.bf16.msra.mxu0 %v900_v30  ;;  %836 = vmatpush3.bf16.msra.mxu1 %v900_v30  ;;  %v377_v41 = vld [vmem:[#allocation2 + $0x10] sm:$0xff]  ;;  %v378_v47 = vld [vmem:[#allocation2 + $0x18] sm:$0xff] }
  0x3b   : > { %807 = vmatprep.subr.bf16.mxu0 %v901_v31  ;;  %829 = vmatprep.subr.bf16.mxu1 %v901_v31  ;;  %v381_v42 = vld [vmem:[#allocation2 + $0x30] sm:$0xff]  ;;  %v379_v44 = vld [vmem:[#allocation2 + $0x20] sm:$0xff]  ;;  %v382_v48 = vld [vmem:[#allocation2 + $0x38] sm:$0xff] }
  0x3c   : > { %v380_v54 = vld [vmem:[#allocation2 + $0x28] sm:$0xff] }
  0x3e   : > { %808 = vmatpush3.bf16.msra.mxu0 %v901_v31  ;;  %837 = vmatpush3.bf16.msra.mxu1 %v901_v31 }
  0x3f   : > { %809 = vmatprep.subr.bf16.mxu0 %v902_v32  ;;  %830 = vmatprep.subr.bf16.mxu1 %v902_v32 }
  0x42   : > { %810 = vmatpush3.bf16.msra.mxu0 %v902_v32  ;;  %838 = vmatpush3.bf16.msra.mxu1 %v902_v32 }
  0x43   : > { %811 = vmatprep.subr.bf16.mxu0 %v903_v35  ;;  %831 = vmatprep.subr.bf16.mxu1 %v903_v35 }
  0x46   : > { %812 = vmatpush3.bf16.msra.mxu0 %v903_v35  ;;  %839 = vmatpush3.bf16.msra.mxu1 %v903_v35 }
  0x47   : > { %813 = vmatprep.subr.bf16.mxu0 %v904_v36  ;;  %832 = vmatprep.subr.bf16.mxu1 %v904_v36 }
  0x4a   : > { %814 = vmatpush3.bf16.msra.mxu0 %v904_v36  ;;  %840 = vmatpush3.bf16.msra.mxu1 %v904_v36 }
  0x4b   : > { %815 = vmatprep.subr.bf16.mxu0 %v905_v37  ;;  %833 = vmatprep.subr.bf16.mxu1 %v905_v37 }
  0x4e   : > { %816 = vmatpush3.bf16.msra.mxu0 %v905_v37  ;;  %841 = vmatpush3.bf16.msra.mxu1 %v905_v37 }
  0x4f   : > { %817 = vmatprep.subr.bf16.mxu0 %v906_v38  ;;  %834 = vmatprep.subr.bf16.mxu1 %v906_v38 }
  0x52   : > { %818 = vmatpush3.bf16.msra.mxu0 %v906_v38  ;;  %842 = vmatpush3.bf16.msra.mxu1 %v906_v38 }
  0x55   : > { %820 = vmatmul.mubr.bf16.vlgmr.msra.gmra.mrb[0].mxu0 %v909_v39  ;;  %824 = vmatmul.mubr.bf16.vlgmr.msra.gmra.mrb[0].mxu1 %v910_v40 }
 0x128   : > { %v821_v45 = vpop.f32.mrb[0].mxu0  ;;  %v825_v46 = vpop.f32.mrb[0].mxu1  ;;  %564 = sbr.rel (%p752_p13) target bundleno = 316 (0x13c), region = 85 }
 0x129   : > { %v546_v49 = vadd.f32 %v821_v45, %v377_v41  ;;  %v550_v50 = vadd.f32 %v825_v46, %v381_v42  ;;  %v513_v51 = vpop.f32.mrb[1].mxu0  ;;  %v529_v52 = vpop.f32.mrb[1].mxu1 }
 0x12a   : > { %v544_v55 = vadd.f32 %v513_v51, %v375_v43  ;;  %v548_v56 = vadd.f32 %v529_v52, %v379_v44  ;;  %v822_v57 = vpop.f32.mrb[2].mxu0  ;;  %v826_v58 = vpop.f32.mrb[2].mxu1 }
 0x12b   : > { %555 = vst.msk [vmem:[#allocation2 + $0x10] sm:$0xff] %vm552_vm1, %v546_v49  ;;  %559 = vst.msk [vmem:[#allocation2 + $0x30] sm:$0xff] %vm552_vm1, %v550_v50  ;;  %v547_v59 = vadd.f32 %v822_v57, %v378_v47  ;;  %v551_v60 = vadd.f32 %v826_v58, %v382_v48  ;;  %v516_v61 = vpop.f32.mrb[3].mxu0  ;;  %v532_v62 = vpop.f32.mrb[3].mxu1 }
 0x12c   : > { %553 = vst.msk [vmem:[#allocation2] sm:$0xff] %vm552_vm1, %v544_v55  ;;  %557 = vst.msk [vmem:[#allocation2 + $0x20] sm:$0xff] %vm552_vm1, %v548_v56  ;;  %v545_v63 = vadd.f32 %v516_v61, %v376_v53  ;;  %v549_v0 = vadd.f32 %v532_v62, %v380_v54 }
 0x12d   : > { %556 = vst.msk [vmem:[#allocation2 + $0x18] sm:$0xff] %vm552_vm1, %v547_v59  ;;  %560 = vst.msk [vmem:[#allocation2 + $0x38] sm:$0xff] %vm552_vm1, %v551_v60 }
 0x12e   : > { %554 = vst.msk [vmem:[#allocation2 + $0x8] sm:$0xff] %vm552_vm1, %v545_v63  ;;  %558 = vst.msk [vmem:[#allocation2 + $0x28] sm:$0xff] %vm552_vm1, %v549_v0 }
 0x132   : > { %v567_v3 = vld [vmem:[#allocation2 + $0x10] sm:$0xff] }
 0x133   : > { %v565_v1 = vld [vmem:[#allocation2] sm:$0xff]  ;;  %v575_v6 = vmax.f32 %v567_v3, 0.0  ;;  %v571_v13 = vld [vmem:[#allocation2 + $0x30] sm:$0xff] }
 0x134   : > { %v573_v4 = vmax.f32 %v565_v1, 0.0  ;;  %v568_v7 = vld [vmem:[#allocation2 + $0x18] sm:$0xff]  ;;  %v569_v8 = vld [vmem:[#allocation2 + $0x20] sm:$0xff]  ;;  %v579_v18 = vmax.f32 %v571_v13, 0.0 }
 0x135   : > { %v566_v2 = vld [vmem:[#allocation2 + $0x8] sm:$0xff]  ;;  %v576_v10 = vmax.f32 %v568_v7, 0.0  ;;  %v577_v11 = vmax.f32 %v569_v8, 0.0  ;;  %v572_v14 = vld [vmem:[#allocation2 + $0x38] sm:$0xff]  ;;  %v766_v17 = vpack.c.bf16 %v575_v6, %v575_v6 }
 0x136   : > { %v574_v5 = vmax.f32 %v566_v2, 0.0  ;;  %v570_v9 = vld [vmem:[#allocation2 + $0x28] sm:$0xff]  ;;  %v764_v15 = vpack.c.bf16 %v573_v4, %v573_v4  ;;  %v580_v22 = vmax.f32 %v572_v14, 0.0  ;;  %v770_v23 = vpack.c.bf16 %v579_v18, %v579_v18 }
 0x137   : > { %v578_v12 = vmax.f32 %v570_v9, 0.0  ;;  %v767_v19 = vpack.c.bf16 %v576_v10, %v576_v10  ;;  %v768_v20 = vpack.c.bf16 %v577_v11, %v577_v11  ;;  %616 = vst.msk [vmem:[%s1068_s9 + $0x8] sm:$0xf] %vm613_vm2, %v766_v17 }
 0x138   : > { %v765_v16 = vpack.c.bf16 %v574_v5, %v574_v5  ;;  %614 = vst.msk [vmem:[%s1068_s9] sm:$0xf] %vm613_vm2, %v764_v15  ;;  %v771_v24 = vpack.c.bf16 %v580_v22, %v580_v22  ;;  %620 = vst.msk [vmem:[%s1068_s9 + $0x18] sm:$0xf] %vm613_vm2, %v770_v23 }
 0x139   : > { %v769_v21 = vpack.c.bf16 %v578_v12, %v578_v12  ;;  %617 = vst.msk [vmem:[%s1068_s9 + $0xc] sm:$0xf] %vm613_vm2, %v767_v19  ;;  %618 = vst.msk [vmem:[%s1068_s9 + $0x10] sm:$0xf] %vm613_vm2, %v768_v20 }
 0x13a   : > { %615 = vst.msk [vmem:[%s1068_s9 + $0x4] sm:$0xf] %vm613_vm2, %v765_v16  ;;  %621 = vst.msk [vmem:[%s1068_s9 + $0x1c] sm:$0xf] %vm613_vm2, %v771_v24 }
 0x13b   : > { %619 = vst.msk [vmem:[%s1068_s9 + $0x14] sm:$0xf] %vm613_vm2, %v769_v21 }
 0x13c PF: > { %s14_s21 = sadd.s32 1, %s965_s21   ;;  %s1147_s15 = smov %s945_s16 }
 0x13d   : > { %p11_p0 = scmp.ge.s32.totalorder %s14_s21, 10   ;;  %s1148_s16 = smov %s1043_s28 }
 0x13e   : > { %s1149_s17 = smov %s957_s19  ;;  %s1150_s18 = smov %s961_s20 }
 0x13f   : > { %s1151_s19 = smov %s1154_s22  ;;  %s1152_s20 = smov %s1158_s23 }
 0x140   :  { %13 = sbr.rel (!%p11_p0) target bundleno = 4 (0x4), region = 126 }

// kernel: rgcn_forward.5
= control target key start
LH: loop header
LB: loop body
LE: loop exit
PB: predicated region body
PF: predicated region fallthrough
CT: control target
= control target key end

     0   :  { %s1179_s21 = smov 0   ;;  %s1181_s22 = smov 0   ;;  %s1346_s0 = inlined_call_operand.vmem [shape: bf16[128,512], index: 0, kind: input, shape index: {}]   ;;  %s1347_s1 = inlined_call_operand.vmem [shape: bf16[512,16], index: 1, kind: input, shape index: {}]   ;;  %s1348_s2 = inlined_call_operand.vmem [shape: bf16[128,16], index: 2, kind: input, shape index: {}]   ;;  %s1349_s3 = inlined_call_operand.vmem [shape: f32[1,16], index: 3, kind: input, shape index: {}]   ;;  %s1350_s4 = inlined_call_operand.vmem [shape: f32[16,8], index: 4, kind: input, shape index: {}]   ;;  %s1351_s5 = inlined_call_operand.vmem [shape: f32[1,8], index: 5, kind: input, shape index: {}]   ;;  %s1352_s6 = inlined_call_operand.vmem [shape: f32[128,8], index: 6, kind: output, shape index: {}]  }
   0x1   :  { %s1183_s23 = smov 0   ;;  %s1185_s24 = smov 0  }
   0x2   :  { %s1187_s25 = smov 0   ;;  %s1189_s26 = smov 0  }
   0x3   :  { %s1191_s27 = smov 0  }
   0x4 LB: > { %s25_s28 = sadd.s32 1, %s1134_s25  ;;  %s28_s29 = sadd.s32 1, %s1138_s26  ;;  %s1142_s27 = sphi %s1191_s27, %s16_s27   ;;  %s1138_s26 = sphi %s1189_s26, %s1358_s26   ;;  %s1134_s25 = sphi %s1187_s25, %s1357_s25   ;;  %s1130_s24 = sphi %s1185_s24, %s1356_s24   ;;  %s1126_s23 = sphi %s1183_s23, %s1355_s23   ;;  %s1122_s22 = sphi %s1181_s22, %s1354_s22   ;;  %s1118_s21 = sphi %s1179_s21, %s1353_s21  }
   0x5   : > { %p26_p0 = scmp.ge.s32.totalorder %s25_s28, 4  ;;  %p44_p1 = scmp.ne.s32.totalorder %s1122_s22, %s1118_s21 }
   0x6   : > { %p45_p2 = scmp.eq.s32.totalorder %s1142_s27, 0  ;;  %s37_s9 = sadd.s32 1, %s1122_s22 }
   0x7   : > { %s1360_s28 = smov (%p26_p0, %s25_s28), 0  ;;  %s1362_s29 = smov (!%p26_p0, %s28_s29), %s1138_s26 }
   0x8   : > { %p46_p3 = por %p45_p2, %p44_p1  ;;  %p30_p4 = scmp.ge.s32.totalorder %s1362_s29, 2 }
   0x9   : > { %s33_s30 = ssub.s32 %s1134_s25, %s1360_s28  ;;  %p877_p6 = scmp.ge.s32.totalorder %s1142_s27, 8 }
   0xa   : > { %s1364_s29 = smov (%p30_p4, %s1362_s29), 0 }
   0xb   : > { %s32_s7 = ssub.s32 %s1138_s26, %s1364_s29  ;;  %220 = sbr.rel (%p877_p6) target bundleno = 29 (0x1d), region = 28 }
   0xc   : > { %s34_s8 = sor.u32 %s33_s30, %s32_s7 }
   0xd   : > { %p35_p5 = scmp.eq.s32.totalorder %s34_s8, 0 }
   0xf   : > { %s1230_s10 = scalar_select %p35_p5, %s1122_s22, %s37_s9  }
  0x12   : > { %223 = sbr.rel (!%p46_p3) target bundleno = 29 (0x1d), region = 32  ;;  %s225_s11 = sand.u32 (%p46_p3), 1, %s1122_s22  }
  0x13   : > { %s916_s12 = sshll.u32 (%p46_p3), %s1138_s26, 5  ;;  %s878_s13 = sshll.u32 (%p46_p3), %s225_s11, 5 }
  0x14   : > { %s230_s14 = sadd.s32 (%p46_p3), %s1134_s25, %s916_s12  ;;  %s227_s19 = scalar_lea.vmem (%p46_p3), [#allocation3], %s878_s13 }
  0x15   : > { %s881_s15 = sshll.u32 (%p46_p3), %s230_s14, 2 }
  0x16   : > { %s232_s18 = scalar_lea.vmem (%p46_p3), %s1346_s0, %s881_s15 }
  0x17   : > { %v248_v0 = vld [vmem:[%s232_s18] sm:$0xf] (%p46_p3)  ;;  %v250_v1 = vld [vmem:[%s232_s18 + $0x10] sm:$0xf] (%p46_p3) }
  0x18   : > { %v252_v2 = vld [vmem:[%s232_s18 + $0x20] sm:$0xf] (%p46_p3)  ;;  %249 = vst [vmem:[%s227_s19] sm:$0xf] (%p46_p3), %v248_v0  ;;  %251 = vst [vmem:[%s227_s19 + $0x4] sm:$0xf] (%p46_p3), %v250_v1 }
  0x19   : > { %253 = vst [vmem:[%s227_s19 + $0x8] sm:$0xf] %v252_v2  ;;  %v254_v3 = vld [vmem:[%s232_s18 + $0x30] sm:$0xf]  ;;  %v256_v4 = vld [vmem:[%s232_s18 + $0x40] sm:$0xf] }
  0x1a   : > { %v258_v5 = vld [vmem:[%s232_s18 + $0x50] sm:$0xf]  ;;  %255 = vst [vmem:[%s227_s19 + $0xc] sm:$0xf] %v254_v3  ;;  %257 = vst [vmem:[%s227_s19 + $0x10] sm:$0xf] %v256_v4 }
  0x1b   : > { %259 = vst [vmem:[%s227_s19 + $0x14] sm:$0xf] %v258_v5  ;;  %v260_v6 = vld [vmem:[%s232_s18 + $0x60] sm:$0xf]  ;;  %v262_v7 = vld [vmem:[%s232_s18 + $0x70] sm:$0xf] }
  0x1c   : > { %261 = vst [vmem:[%s227_s19 + $0x18] sm:$0xf] %v260_v6  ;;  %263 = vst [vmem:[%s227_s19 + $0x1c] sm:$0xf] %v262_v7 }
  0x1d PF: > { %p882_p7 = scmp.ge.s32.totalorder %s1142_s27, 1  ;;  %p319_p8 = scmp.lt.s32.totalorder %s1142_s27, 9 }
  0x1f   : > { %p320_p9 = pnand %p882_p7, %p319_p8 }
  0x20   : > { %s326_s20 = sand.u32 (!%p320_p9), 1, %s1118_s21   ;;  %s884_s30 = sshll.u32 (!%p320_p9), %s1126_s23, 4 }
  0x21   : > { %323 = sbr.rel (%p320_p9) target bundleno = 532 (0x214), region = 81  ;;  %s883_s7 = sshll.u32 (!%p320_p9), %s326_s20, 5 }
  0x22   : > { %p367_p10 = scmp.lt.s32.totalorder (!%p320_p9), %s884_s30, 63  ;;  %s886_s8 = sshll.u32 (!%p320_p9), %s1130_s24, 3 }
  0x23   : > { %p373_p11 = scmp.lt.s32.totalorder (!%p320_p9), %s886_s8, 15  ;;  %s1257_s24 = scalar_lea.vmem (!%p320_p9), [#allocation3], %s883_s7 }
  0x24   : > { %p890_p12 = scmp.ne.s32.totalorder (!%p320_p9), %s1126_s23, 0 }
  0x28   : > { %s1366_s30 = smov (!%p367_p10, %s884_s30), 63  ;;  %s1368_s8 = smov (!%p373_p11, %s886_s8), 15 }
  0x29   : > { %s885_s9 = sshll.u32 %s1366_s30, 2  ;;  %s887_s14 = sshll.u32 %s1368_s8, 2  ;;  %v891_v9 = vld [vmem:[%s1349_s3] ss:$0 sm:$0xff] (!%p890_p12)  ;;  %vm420_vm0 = vcmask (!%p890_p12), 130048  }
  0x2a   : > { %s1247_s13 = scalar_lea.vmem %s1347_s1, %s885_s9  ;;  %s889_s15 = sshll.u32 %s1368_s8, 3 }
  0x2b   : > { %s376_s18 = scalar_lea.vmem %s1348_s2, %s887_s14  ;;  %s1255_s20 = scalar_lea.vmem %s1352_s6, %s889_s15 }
  0x2c   : > { %388 = sbr.rel (%p890_p12) target bundleno = 53 (0x35), region = 89  ;;  %v918_v8 = vld [vmem:[%s376_s18] sm:$0xff] (!%p890_p12)   ;;  %v933_v10 = vld [vmem:[%s376_s18 + $0x8] sm:$0xff] (!%p890_p12)   ;;  %v934_v15 = vld [vmem:[%s376_s18 + $0x10] sm:$0xff] (!%p890_p12)  }
  0x2d   : > { %v919_v11 = vunpack.c.l.bf16 (!%p890_p12), %v918_v8  ;;  %v920_v12 = vunpack.c.h.bf16 (!%p890_p12), %v918_v8  ;;  %v923_v13 = vunpack.c.l.bf16 (!%p890_p12), %v933_v10  ;;  %v924_v14 = vunpack.c.h.bf16 (!%p890_p12), %v933_v10  ;;  %v935_v16 = vld [vmem:[%s376_s18 + $0x18] sm:$0xff] (!%p890_p12)  }
  0x2e   : > { %v927_v17 = vunpack.c.l.bf16 (!%p890_p12), %v934_v15  ;;  %v928_v18 = vunpack.c.h.bf16 (!%p890_p12), %v934_v15  ;;  %v931_v19 = vunpack.c.l.bf16 (!%p890_p12), %v935_v16  ;;  %v932_v20 = vunpack.c.h.bf16 (!%p890_p12), %v935_v16 }
  0x2f   : > { %v412_v21 = vadd.f32 (!%p890_p12), %v919_v11, %v891_v9  ;;  %v413_v22 = vadd.f32 (!%p890_p12), %v920_v12, %v891_v9  ;;  %v414_v23 = vadd.f32 (!%p890_p12), %v923_v13, %v891_v9  ;;  %v415_v24 = vadd.f32 (!%p890_p12), %v924_v14, %v891_v9 }
  0x30   : > { %v416_v25 = vadd.f32 (!%p890_p12), %v927_v17, %v891_v9  ;;  %v417_v26 = vadd.f32 (!%p890_p12), %v928_v18, %v891_v9  ;;  %v418_v27 = vadd.f32 (!%p890_p12), %v931_v19, %v891_v9  ;;  %v419_v28 = vadd.f32 (!%p890_p12), %v932_v20, %v891_v9 }
  0x31   : > { %421 = vst.msk [vmem:[#allocation2] sm:$0xff] (!%p890_p12), %vm420_vm0, %v412_v21  ;;  %422 = vst.msk [vmem:[#allocation2 + $0x8] sm:$0xff] (!%p890_p12), %vm420_vm0, %v413_v22 }
  0x32   : > { %423 = vst.msk [vmem:[#allocation2 + $0x10] sm:$0xff] (!%p890_p12), %vm420_vm0, %v414_v23  ;;  %424 = vst.msk [vmem:[#allocation2 + $0x18] sm:$0xff] (!%p890_p12), %vm420_vm0, %v415_v24 }
  0x33   : > { %425 = vst.msk [vmem:[#allocation2 + $0x20] sm:$0xff] %vm420_vm0, %v416_v25  ;;  %426 = vst.msk [vmem:[#allocation2 + $0x28] sm:$0xff] %vm420_vm0, %v417_v26 }
  0x34   : > { %427 = vst.msk [vmem:[#allocation2 + $0x30] sm:$0xff] %vm420_vm0, %v418_v27  ;;  %428 = vst.msk [vmem:[#allocation2 + $0x38] sm:$0xff] %vm420_vm0, %v419_v28 }
  0x35 PF: > { %v1076_v29 = vld [vmem:[%s1247_s13] sm:$0xff]   ;;  %v1077_v30 = vld [vmem:[%s1247_s13 + $0x8] sm:$0xff]   ;;  %v1078_v31 = vld [vmem:[%s1247_s13 + $0x10] sm:$0xff]   ;;  %vm606_vm1 = vcmask 130048   ;;  %p904_p13 = scmp.ne.s32.totalorder %s1126_s23, 3 }
  0x36   : > { %958 = vmatprep.subr.bf16.mxu0 %v1076_v29  ;;  %1002 = vmatprep.subr.bf16.mxu1 %v1076_v29  ;;  %v1079_v32 = vld [vmem:[%s1247_s13 + $0x18] sm:$0xff]   ;;  %v1084_v33 = vld [vmem:[%s1257_s24] sm:$0xff]   ;;  %v1085_v34 = vld [vmem:[%s1257_s24 + $0x10] sm:$0xff]   ;;  %vm765_vm2 = vcmask (!%p904_p13), 64512  }
  0x37   : > { %959 = vmatpush3.bf16.msra.mxu0 %v1076_v29  ;;  %1010 = vmatpush3.bf16.msra.mxu1 %v1076_v29  ;;  %v1080_v35 = vld [vmem:[%s1247_s13 + $0x20] sm:$0xff]   ;;  %v1081_v36 = vld [vmem:[%s1247_s13 + $0x28] sm:$0xff]   ;;  %v1082_v37 = vld [vmem:[%s1247_s13 + $0x30] sm:$0xff]  }
  0x38   : > { %960 = vmatprep.subr.bf16.mxu0 %v1077_v30  ;;  %1003 = vmatprep.subr.bf16.mxu1 %v1077_v30  ;;  %v1083_v38 = vld [vmem:[%s1247_s13 + $0x38] sm:$0xff]   ;;  %v1086_v39 = vld [vmem:[%s1257_s24 + $0x8] sm:$0xff]   ;;  %v627_v1 = vld [vmem:[%s1350_s4] sm:$0xff] (!%p904_p13) }
  0x39   : > { %974 = vmatprep.mubr.bf16.mxu0 %v1084_v33  ;;  %978 = vmatprep.mubr.bf16.mxu1 %v1085_v34  ;;  %v1087_v40 = vld [vmem:[%s1257_s24 + $0x18] sm:$0xff]   ;;  %v628_v2 = vld [vmem:[%s1350_s4 + $0x8] sm:$0xff] (!%p904_p13)  ;;  %v905_v12 = vld [vmem:[%s1351_s5] ss:$0 sm:$0xff] (!%p904_p13) }
  0x3a   : > { %v429_v43 = vld [vmem:[#allocation2] sm:$0xff]  ;;  %v430_v53 = vld [vmem:[#allocation2 + $0x8] sm:$0xff]  ;;  %v998_v4 = vpack.c.bf16 (!%p904_p13), %v628_v2, %v627_v1 }
  0x3b   : > { %961 = vmatpush3.bf16.msra.mxu0 %v1077_v30  ;;  %1011 = vmatpush3.bf16.msra.mxu1 %v1077_v30  ;;  %v431_v41 = vld [vmem:[#allocation2 + $0x10] sm:$0xff]  ;;  %v432_v47 = vld [vmem:[#allocation2 + $0x18] sm:$0xff] }
  0x3c   : > { %962 = vmatprep.subr.bf16.mxu0 %v1078_v31  ;;  %1004 = vmatprep.subr.bf16.mxu1 %v1078_v31  ;;  %v435_v42 = vld [vmem:[#allocation2 + $0x30] sm:$0xff]  ;;  %v433_v44 = vld [vmem:[#allocation2 + $0x20] sm:$0xff]  ;;  %v436_v48 = vld [vmem:[#allocation2 + $0x38] sm:$0xff] }
  0x3d   : > { %v434_v54 = vld [vmem:[#allocation2 + $0x28] sm:$0xff] }
  0x3f   : > { %963 = vmatpush3.bf16.msra.mxu0 %v1078_v31  ;;  %1012 = vmatpush3.bf16.msra.mxu1 %v1078_v31 }
  0x40   : > { %964 = vmatprep.subr.bf16.mxu0 %v1079_v32  ;;  %1005 = vmatprep.subr.bf16.mxu1 %v1079_v32 }
  0x43   : > { %965 = vmatpush3.bf16.msra.mxu0 %v1079_v32  ;;  %1013 = vmatpush3.bf16.msra.mxu1 %v1079_v32 }
  0x44   : > { %966 = vmatprep.subr.bf16.mxu0 %v1080_v35  ;;  %1006 = vmatprep.subr.bf16.mxu1 %v1080_v35 }
  0x47   : > { %967 = vmatpush3.bf16.msra.mxu0 %v1080_v35  ;;  %1014 = vmatpush3.bf16.msra.mxu1 %v1080_v35 }
  0x48   : > { %968 = vmatprep.subr.bf16.mxu0 %v1081_v36  ;;  %1007 = vmatprep.subr.bf16.mxu1 %v1081_v36 }
  0x4b   : > { %969 = vmatpush3.bf16.msra.mxu0 %v1081_v36  ;;  %1015 = vmatpush3.bf16.msra.mxu1 %v1081_v36 }
  0x4c   : > { %970 = vmatprep.subr.bf16.mxu0 %v1082_v37  ;;  %1008 = vmatprep.subr.bf16.mxu1 %v1082_v37 }
  0x4f   : > { %971 = vmatpush3.bf16.msra.mxu0 %v1082_v37  ;;  %1016 = vmatpush3.bf16.msra.mxu1 %v1082_v37 }
  0x50   : > { %972 = vmatprep.subr.bf16.mxu0 %v1083_v38  ;;  %1009 = vmatprep.subr.bf16.mxu1 %v1083_v38 }
  0x53   : > { %973 = vmatpush3.bf16.msra.mxu0 %v1083_v38  ;;  %1017 = vmatpush3.bf16.msra.mxu1 %v1083_v38 }
  0x54   : > { %999 = vmatprep.subr.bf16.mxu0 (!%p904_p13), %v998_v4  ;;  %1018 = vmatprep.subr.bf16.mxu1 (!%p904_p13), %v998_v4 }
  0x56   : > { %975 = vmatmul.mubr.bf16.vlgmr.msra.gmra.mrb[0].mxu0 %v1086_v39  ;;  %979 = vmatmul.mubr.bf16.vlgmr.msra.gmra.mrb[0].mxu1 %v1087_v40 }
  0x57   : > { %1001 = vmatpush3.bf16.msra.mxu0 (!%p904_p13), %v998_v4  ;;  %1019 = vmatpush3.bf16.msra.mxu1 (!%p904_p13), %v998_v4 }
 0x129   : > { %v976_v45 = vpop.f32.mrb[0].mxu0  ;;  %v980_v46 = vpop.f32.mrb[0].mxu1  ;;  %618 = sbr.rel (%p904_p13) target bundleno = 532 (0x214), region = 93 }
 0x12a   : > { %v600_v49 = vadd.f32 %v976_v45, %v431_v41  ;;  %v604_v50 = vadd.f32 %v980_v46, %v435_v42  ;;  %v567_v51 = vpop.f32.mrb[1].mxu0  ;;  %v583_v52 = vpop.f32.mrb[1].mxu1 }
 0x12b   : > { %v598_v55 = vadd.f32 %v567_v51, %v429_v43  ;;  %v602_v56 = vadd.f32 %v583_v52, %v433_v44  ;;  %v977_v57 = vpop.f32.mrb[2].mxu0  ;;  %v981_v58 = vpop.f32.mrb[2].mxu1 }
 0x12c   : > { %609 = vst.msk [vmem:[#allocation2 + $0x10] sm:$0xff] %vm606_vm1, %v600_v49  ;;  %613 = vst.msk [vmem:[#allocation2 + $0x30] sm:$0xff] %vm606_vm1, %v604_v50  ;;  %v601_v59 = vadd.f32 %v977_v57, %v432_v47  ;;  %v605_v60 = vadd.f32 %v981_v58, %v436_v48  ;;  %v570_v61 = vpop.f32.mrb[3].mxu0  ;;  %v586_v62 = vpop.f32.mrb[3].mxu1 }
 0x12d   : > { %607 = vst.msk [vmem:[#allocation2] sm:$0xff] %vm606_vm1, %v598_v55  ;;  %611 = vst.msk [vmem:[#allocation2 + $0x20] sm:$0xff] %vm606_vm1, %v602_v56  ;;  %v599_v63 = vadd.f32 %v570_v61, %v430_v53  ;;  %v603_v0 = vadd.f32 %v586_v62, %v434_v54 }
 0x12e   : > { %610 = vst.msk [vmem:[#allocation2 + $0x18] sm:$0xff] %vm606_vm1, %v601_v59  ;;  %614 = vst.msk [vmem:[#allocation2 + $0x38] sm:$0xff] %vm606_vm1, %v605_v60 }
 0x12f   : > { %608 = vst.msk [vmem:[#allocation2 + $0x8] sm:$0xff] %vm606_vm1, %v599_v63  ;;  %612 = vst.msk [vmem:[#allocation2 + $0x28] sm:$0xff] %vm606_vm1, %v603_v0 }
 0x133   : > { %v621_v8 = vld [vmem:[#allocation2 + $0x10] sm:$0xff] }
 0x134   : > { %v619_v3 = vld [vmem:[#allocation2] sm:$0xff]  ;;  %v625_v9 = vld [vmem:[#allocation2 + $0x30] sm:$0xff] }
 0x135   : > { %986 = vmatprep.mubr.msk.f32.mxu0 %vm606_vm1, %v619_v3  ;;  %v623_v5 = vld [vmem:[#allocation2 + $0x20] sm:$0xff]  ;;  %v622_v10 = vld [vmem:[#allocation2 + $0x18] sm:$0xff] }
 0x136   : > { %992 = vmatprep.mubr.msk.f32.mxu1 %vm606_vm1, %v623_v5  ;;  %v620_v6 = vld [vmem:[#allocation2 + $0x8] sm:$0xff]  ;;  %v626_v11 = vld [vmem:[#allocation2 + $0x38] sm:$0xff] }
 0x137   : > { %v624_v7 = vld [vmem:[#allocation2 + $0x28] sm:$0xff]  ;;  %987 = vmatmul.mubr.msk.f32.vlgmr.msra.gmra.mrb[0].mxu0 %vm606_vm1, %v620_v6 }
 0x138   : > { %993 = vmatmul.mubr.msk.f32.vlgmr.msra.gmra.mrb[0].mxu1 %vm606_vm1, %v624_v7  ;;  %989 = vmatprep.mubr.msk.f32.mxu0 %vm606_vm1, %v621_v8 }
 0x139   : > { %995 = vmatprep.mubr.msk.f32.mxu1 %vm606_vm1, %v625_v9 }
 0x13b   : > { %990 = vmatmul.mubr.msk.f32.gmra.mrb[2].mxu0 %vm606_vm1, %v622_v10 }
 0x13c   : > { %996 = vmatmul.mubr.msk.f32.gmra.mrb[2].mxu1 %vm606_vm1, %v626_v11 }
 0x20a   : > { %v988_v13 = vpop.f32.mrb[0].mxu0 }
 0x20b   : > { %v994_v14 = vpop.f32.mrb[0].mxu1  ;;  %v732_v15 = vadd.f32 %v988_v13, %v905_v12  ;;  %v726_v17 = vpop.f32.mrb[1].mxu0 }
 0x20c   : > { %v752_v16 = vadd.f32 %v994_v14, %v905_v12  ;;  %v746_v18 = vpop.f32.mrb[1].mxu1  ;;  %v727_v19 = vadd.f32 %v905_v12, %v726_v17 }
 0x20d   : > { %v747_v20 = vadd.f32 %v905_v12, %v746_v18  ;;  %767 = vst.msk [vmem:[%s1255_s20 + $0x8] sm:$0xff] %vm765_vm2, %v732_v15 }
 0x20e   : > { %771 = vst.msk [vmem:[%s1255_s20 + $0x28] sm:$0xff] %vm765_vm2, %v752_v16  ;;  %766 = vst.msk [vmem:[%s1255_s20] sm:$0xff] %vm765_vm2, %v727_v19  ;;  %v991_v21 = vpop.f32.mrb[2].mxu0 }
 0x20f   : > { %770 = vst.msk [vmem:[%s1255_s20 + $0x20] sm:$0xff] %vm765_vm2, %v747_v20  ;;  %v997_v22 = vpop.f32.mrb[2].mxu1  ;;  %v742_v23 = vadd.f32 %v991_v21, %v905_v12  ;;  %v736_v25 = vpop.f32.mrb[3].mxu0 }
 0x210   : > { %v762_v24 = vadd.f32 %v997_v22, %v905_v12  ;;  %v756_v26 = vpop.f32.mrb[3].mxu1  ;;  %v737_v27 = vadd.f32 %v905_v12, %v736_v25 }
 0x211   : > { %v757_v28 = vadd.f32 %v905_v12, %v756_v26  ;;  %769 = vst.msk [vmem:[%s1255_s20 + $0x18] sm:$0xff] %vm765_vm2, %v742_v23 }
 0x212   : > { %773 = vst.msk [vmem:[%s1255_s20 + $0x38] sm:$0xff] %vm765_vm2, %v762_v24  ;;  %768 = vst.msk [vmem:[%s1255_s20 + $0x10] sm:$0xff] %vm765_vm2, %v737_v27 }
 0x213   : > { %772 = vst.msk [vmem:[%s1255_s20 + $0x30] sm:$0xff] %vm765_vm2, %v757_v28 }
 0x214 PF: > { %s16_s27 = sadd.s32 1, %s1142_s27   ;;  %s1353_s21 = smov %s1122_s22 }
 0x215   : > { %p13_p0 = scmp.ge.s32.totalorder %s16_s27, 10   ;;  %s1354_s22 = smov %s1230_s10 }
 0x216   : > { %s1355_s23 = smov %s1134_s25  ;;  %s1356_s24 = smov %s1138_s26 }
 0x217   : > { %s1357_s25 = smov %s1360_s28  ;;  %s1358_s26 = smov %s1364_s29 }
 0x218   :  { %15 = sbr.rel (!%p13_p0) target bundleno = 4 (0x4), region = 134 }

</bundles_post_ra>
